<compile_context>
chip_gen: v7x
topology: tpu7x:2x2x1
jax: 0.10.0
libtpu: 0.0.40
codegen_flags: <defaults>
</compile_context>

<pallas_src>
import jax
import jax.numpy as jnp
from jax import lax
from jax.experimental import pallas as pl
from jax.experimental.pallas import tpu as pltpu


def _pool_agg_kernel(xcol_ref, w1_ref, s1_ref, b1_ref,
                     pm_ref, w2_ref, s2_ref, b2_ref, out_ref):
    """Whole PoolAgg module in one grid step.

    Layout: channels on sublanes, B*H*W on lanes (lane-dense intermediates).
      xcol_ref: (9*Cin, B*H*W)        bf16  im2col'd padded input (all taps)
      w1_ref:   (OC*Cmid, 9*Cin)      bf16  conv1 weights, all branches fused
      s1/b1:    (OC*Cmid, 1)          f32   folded BatchNorm1 (eval)
      pm_ref:   (B*H*W, 9*B)          f32   tap x batch pool masks (1/HW folded)
      w2_ref:   (9, OC*Cout, OC*Cmid) f32   conv2 weights, per-tap block-diag
      s2/b2:    (OC*Cout, 1)          f32   folded BatchNorm2 (eval)
      out_ref:  (OC*Cout, B)          f32
    """
    # conv1 for all 3x3 taps and all branches: ONE bf16 MXU matmul, f32 acc.
    h1 = jnp.dot(w1_ref[...], xcol_ref[...],
                 preferred_element_type=jnp.float32)          # (OC*Cmid, BHW)
    h1 = h1 * s1_ref[...] + b1_ref[...]                       # BN1 (folded)
    h1 = h1 * pl.reciprocal(1.0 + jnp.exp(-h1), approx=True)  # SiLU (EUP)

    # AdaptiveAvgPool2d(1) and BN2 commute with conv2 (linear/affine), so pool
    # first.  All nine tap-window sums for all batches come out of a single
    # mask matmul (1/HW already folded in); column k*B+b holds tap k, batch b.
    pooled = jnp.dot(h1, pm_ref[...],
                     preferred_element_type=jnp.float32)      # (OC*Cmid, 9*B)

    # conv2 as per-tap block-diagonal contractions on the pooled sums; the
    # M dim is just B, so the padded full-resolution h2 never materializes.
    C2, B = out_ref.shape
    acc = jnp.zeros((C2, B), jnp.float32)
    for k in range(9):                                        # static unroll, tiny
        acc = acc + jnp.dot(w2_ref[k], pooled[:, k * B:(k + 1) * B],
                            preferred_element_type=jnp.float32)   # (OC*Cout, B)
    out_ref[...] = acc * s2_ref[...] + b2_ref[...]            # BN2 (folded)


def pool_agg(x_nchw, params):
    """x_nchw: (B, Cin, H, W) -> (B, out_channel, out_size)."""
    w1, s1, b1 = params["w1"], params["s1"], params["b1"]  # (OC,9,Cin,Cmid),(OC,Cmid)
    w2, s2, b2 = params["w2"], params["s2"], params["b2"]  # (OC,9,Cmid,Cout),(OC,Cout)
    OC, _, Cin, Cmid = w1.shape
    Cout = w2.shape[-1]
    B, _, H, W = x_nchw.shape
    HW, BHW = H * W, B * H * W
    C1, C2 = OC * Cmid, OC * Cout

    # ---- im2col in plain JAX (hoisted out of the kernel), channels-last ----
    x = jnp.transpose(x_nchw, (0, 2, 3, 1)).astype(jnp.float32)      # NHWC
    xp = jnp.pad(x, ((0, 0), (1, 1), (1, 1), (0, 0)))                # conv pad=1
    taps = [xp[:, kh:kh + H, kw:kw + W, :] for kh in range(3) for kw in range(3)]
    xcol = jnp.stack(taps, axis=3)                                   # (B,H,W,9,Cin)
    xcolT = xcol.reshape(BHW, 9 * Cin).T.astype(jnp.bfloat16)        # (9*Cin, BHW)

    # ---- conv1 weights: all branches fused, channels on sublanes ----
    w1T = jnp.transpose(w1, (0, 3, 1, 2)).reshape(C1, 9 * Cin).astype(jnp.bfloat16)

    # ---- conv2 weights: per-tap block-diagonal over branches ----
    w2dT = jnp.zeros((9, C2, C1), jnp.float32)
    for br in range(OC):
        blk = jnp.transpose(w2[br], (0, 2, 1))                       # (9, Cout, Cmid)
        w2dT = w2dT.at[:, br * Cout:(br + 1) * Cout,
                       br * Cmid:(br + 1) * Cmid].set(blk)

    # ---- lane-packed pooling mask (folds AdaptiveAvgPool2d(1)) ----
    # For tap (kh,kw) the zero-padded conv window sums h1 over all rows/cols
    # except one boundary row/col; mask value is 1/HW inside that region.
    # Column k*B + b selects tap k of batch b -> one (BHW, 9B) matrix instead
    # of nine lane-padded (BHW, B) slabs.
    l = jnp.arange(BHW)
    bb, yy, xx = l // HW, (l % HW) // W, l % W
    kh, kw = jnp.arange(9) // 3, jnp.arange(9) % 3
    row_ok = jnp.where(kh[:, None] == 0, yy[None, :] <= H - 2,
                       jnp.where(kh[:, None] == 2, yy[None, :] >= 1, True))
    col_ok = jnp.where(kw[:, None] == 0, xx[None, :] <= W - 2,
                       jnp.where(kw[:, None] == 2, xx[None, :] >= 1, True))
    win = jnp.logical_and(row_ok, col_ok)                            # (9, BHW)
    bsel = bb[:, None] == jnp.arange(B)[None, :]                     # (BHW, B)
    pm3 = (win[:, :, None] & bsel[None, :, :]).astype(jnp.float32) / float(HW)
    pm = jnp.transpose(pm3, (1, 0, 2)).reshape(BHW, 9 * B)           # (BHW, 9B)

    s1c, b1c = s1.reshape(C1, 1), b1.reshape(C1, 1)
    s2c, b2c = s2.reshape(C2, 1), b2.reshape(C2, 1)

    # Single grid step: the whole module is a handful of small matmuls, so a
    # grid over branches/taps would only add fixed per-step overhead.
    # NOTE: for large B*H*W, tile the lane (spatial) dim with a grid axis and
    # accumulate the pooled sums across steps (VMEM guard, esp. v7x's 64 MiB).
    out2d = pl.pallas_call(
        _pool_agg_kernel,
        out_shape=jax.ShapeDtypeStruct((C2, B), jnp.float32),
        grid=(1,),
        in_specs=[
            pl.BlockSpec((9 * Cin, BHW), lambda i: (0, 0)),
            pl.BlockSpec((C1, 9 * Cin), lambda i: (0, 0)),
            pl.BlockSpec((C1, 1), lambda i: (0, 0)),
            pl.BlockSpec((C1, 1), lambda i: (0, 0)),
            pl.BlockSpec((BHW, 9 * B), lambda i: (0, 0)),
            pl.BlockSpec((9, C2, C1), lambda i: (0, 0, 0)),
            pl.BlockSpec((C2, 1), lambda i: (0, 0)),
            pl.BlockSpec((C2, 1), lambda i: (0, 0)),
        ],
        out_specs=pl.BlockSpec((C2, B), lambda i: (0, 0)),
        compiler_params=pltpu.CompilerParams(
            dimension_semantics=("arbitrary",)),
    )(xcolT, w1T, s1c, b1c, pm, w2dT, s2c, b2c)

    # (OC*Cout, B) -> (B, OC, Cout); at these sizes the output cannot be
    # lane-dense anyway, so the trivial transpose/reshape stays in XLA.
    return jnp.transpose(out2d, (1, 0)).reshape(B, OC, Cout)


def init_params(key, out_channel, in_size, mid_size, out_size, eps=1e-3):
    """Deterministic synthetic weights; general eval-mode BN fold
    (here running stats are fresh: mean=0, var=1)."""
    ks = jax.random.split(key, 6)
    w1 = jax.random.normal(ks[0], (out_channel, 3, 3, in_size, mid_size),
                           jnp.float32) * (1.0 / (3.0 * jnp.sqrt(in_size)))
    w2 = jax.random.normal(ks[1], (out_channel, 3, 3, mid_size, out_size),
                           jnp.float32) * (1.0 / (3.0 * jnp.sqrt(mid_size)))
    g1 = 1.0 + 0.1 * jax.random.normal(ks[2], (out_channel, mid_size), jnp.float32)
    be1 = 0.1 * jax.random.normal(ks[3], (out_channel, mid_size), jnp.float32)
    g2 = 1.0 + 0.1 * jax.random.normal(ks[4], (out_channel, out_size), jnp.float32)
    be2 = 0.1 * jax.random.normal(ks[5], (out_channel, out_size), jnp.float32)
    rm1 = jnp.zeros((out_channel, mid_size), jnp.float32)
    rv1 = jnp.ones((out_channel, mid_size), jnp.float32)
    rm2 = jnp.zeros((out_channel, out_size), jnp.float32)
    rv2 = jnp.ones((out_channel, out_size), jnp.float32)
    s1 = g1 / jnp.sqrt(rv1 + eps)
    b1 = be1 - rm1 * s1
    s2 = g2 / jnp.sqrt(rv2 + eps)
    b2 = be2 - rm2 * s2
    return dict(
        w1=w1.reshape(out_channel, 9, in_size, mid_size),
        w2=w2.reshape(out_channel, 9, mid_size, out_size),
        s1=s1, b1=b1, s2=s2, b2=b2)


def pool_agg_reference(x_nchw, params):
    """Pure-JAX reference (lax.conv) for correctness checking."""
    OC, _, Cin, Cmid = params["w1"].shape
    Cout = params["w2"].shape[-1]
    x = jnp.transpose(x_nchw, (0, 2, 3, 1)).astype(jnp.float32)   # NHWC
    dn = ("NHWC", "HWIO", "NHWC")
    outs = []
    for i in range(OC):
        w1 = params["w1"][i].reshape(3, 3, Cin, Cmid)
        h = lax.conv_general_dilated(x, w1, (1, 1), "SAME", dimension_numbers=dn)
        h = h * params["s1"][i] + params["b1"][i]
        h = h * jax.nn.sigmoid(h)
        w2 = params["w2"][i].reshape(3, 3, Cmid, Cout)
        h = lax.conv_general_dilated(h, w2, (1, 1), "SAME", dimension_numbers=dn)
        h = h * params["s2"][i] + params["b2"][i]
        outs.append(jnp.mean(h, axis=(1, 2)))        # (B, Cout)
    return jnp.stack(outs, axis=1)                   # (B, OC, Cout)


if __name__ == "__main__":
    # Module config: PoolAgg(out_channel=3, in_size=4, mid_size=8, out_size=8)
    out_channel, in_size, mid_size, out_size = 3, 4, 8, 8
    B, H, W = 2, 16, 16

    key = jax.random.PRNGKey(0)
    kx, kp = jax.random.split(key)
    x = jax.random.normal(kx, (B, in_size, H, W), jnp.float32)   # NCHW like PyTorch
    params = init_params(kp, out_channel, in_size, mid_size, out_size)

    out = jax.block_until_ready(jax.jit(pool_agg)(x, params))
    ref = jax.block_until_ready(pool_agg_reference(x, params))

    assert out.shape == (B, out_channel, out_size), out.shape
    assert jnp.allclose(out, ref, atol=2e-2, rtol=2e-2), (
        float(jnp.max(jnp.abs(out - ref))))

    print("KERNEL_OK")
</pallas_src>

<mosaic_0001>
module attributes {stable_mosaic.version = 11 : i64} {
  func.func @_pool_agg_kernel(%arg0: i32, %arg1: memref<36x512xbf16, #tpu.memory_space<vmem>>, %arg2: memref<24x36xbf16, #tpu.memory_space<vmem>>, %arg3: memref<24x1xf32, #tpu.memory_space<vmem>>, %arg4: memref<24x1xf32, #tpu.memory_space<vmem>>, %arg5: memref<512x18xf32, #tpu.memory_space<vmem>>, %arg6: memref<9x24x24xf32, #tpu.memory_space<vmem>>, %arg7: memref<24x1xf32, #tpu.memory_space<vmem>>, %arg8: memref<24x1xf32, #tpu.memory_space<vmem>>, %arg9: memref<24x2xf32, #tpu.memory_space<vmem>>) attributes {dimension_semantics = [#tpu.dimension_semantics<arbitrary>], iteration_bounds = array<i64: 1>, scalar_prefetch = 0 : i64, scratch_operands = 0 : i64, tpu.core_type = #tpu.core_type<tc>, window_params = [{pipeline_mode = #tpu.pipeline_mode<synchronous>, transform_indices = @transform_0, window_bounds = array<i64: 36, 512>}, {pipeline_mode = #tpu.pipeline_mode<synchronous>, transform_indices = @transform_1, window_bounds = array<i64: 24, 36>}, {pipeline_mode = #tpu.pipeline_mode<synchronous>, transform_indices = @transform_2, window_bounds = array<i64: 24, 1>}, {pipeline_mode = #tpu.pipeline_mode<synchronous>, transform_indices = @transform_3, window_bounds = array<i64: 24, 1>}, {pipeline_mode = #tpu.pipeline_mode<synchronous>, transform_indices = @transform_4, window_bounds = array<i64: 512, 18>}, {pipeline_mode = #tpu.pipeline_mode<synchronous>, transform_indices = @transform_5, window_bounds = array<i64: 9, 24, 24>}, {pipeline_mode = #tpu.pipeline_mode<synchronous>, transform_indices = @transform_6, window_bounds = array<i64: 24, 1>}, {pipeline_mode = #tpu.pipeline_mode<synchronous>, transform_indices = @transform_7, window_bounds = array<i64: 24, 1>}, {pipeline_mode = #tpu.pipeline_mode<synchronous>, transform_indices = @transform_8, window_bounds = array<i64: 24, 2>}]} {
    %c0 = arith.constant 0 : index
    %c0_0 = arith.constant 0 : index
    %0 = vector.load %arg2[%c0, %c0_0] : memref<24x36xbf16, #tpu.memory_space<vmem>>, vector<24x36xbf16>
    %c0_1 = arith.constant 0 : index
    %c0_2 = arith.constant 0 : index
    %1 = vector.load %arg1[%c0_1, %c0_2] : memref<36x512xbf16, #tpu.memory_space<vmem>>, vector<36x512xbf16>
    %cst = arith.constant dense<0.000000e+00> : vector<24x512xf32>
    %2 = tpu.matmul %0, %1, %cst {dimension_numbers = #tpu.dot_dimension_numbers<[1], [0], [0], [1], [0, 0, 1, 1], [], []>} : vector<24x36xbf16>, vector<36x512xbf16>, vector<24x512xf32> -> vector<24x512xf32>
    %c0_3 = arith.constant 0 : index
    %c0_4 = arith.constant 0 : index
    %3 = vector.load %arg3[%c0_3, %c0_4] : memref<24x1xf32, #tpu.memory_space<vmem>>, vector<24x1xf32>
    %4 = vector.broadcast %3 : vector<24x1xf32> to vector<24x512xf32>
    %5 = arith.mulf %2, %4 : vector<24x512xf32>
    %c0_5 = arith.constant 0 : index
    %c0_6 = arith.constant 0 : index
    %6 = vector.load %arg4[%c0_5, %c0_6] : memref<24x1xf32, #tpu.memory_space<vmem>>, vector<24x1xf32>
    %7 = vector.broadcast %6 : vector<24x1xf32> to vector<24x512xf32>
    %8 = arith.addf %5, %7 : vector<24x512xf32>
    %cst_7 = arith.constant 0.000000e+00 : f32
    %9 = vector.broadcast %cst_7 : f32 to vector<24x512xf32>
    %10 = arith.subf %9, %8 : vector<24x512xf32>
    %11 = math.exp %10 : vector<24x512xf32>
    %cst_8 = arith.constant 1.000000e+00 : f32
    %12 = vector.broadcast %cst_8 : f32 to vector<24x512xf32>
    %13 = arith.addf %12, %11 : vector<24x512xf32>
    %14 = tpu.reciprocal %13 {approx = true} : vector<24x512xf32> -> vector<24x512xf32>
    %15 = arith.mulf %8, %14 : vector<24x512xf32>
    %c0_9 = arith.constant 0 : index
    %c0_10 = arith.constant 0 : index
    %16 = vector.load %arg5[%c0_9, %c0_10] : memref<512x18xf32, #tpu.memory_space<vmem>>, vector<512x18xf32>
    %cst_11 = arith.constant dense<0.000000e+00> : vector<24x18xf32>
    %17 = tpu.matmul %15, %16, %cst_11 {dimension_numbers = #tpu.dot_dimension_numbers<[1], [0], [0], [1], [0, 0, 1, 1], [], []>} : vector<24x512xf32>, vector<512x18xf32>, vector<24x18xf32> -> vector<24x18xf32>
    %cst_12 = arith.constant 0.000000e+00 : f32
    %18 = vector.broadcast %cst_12 : f32 to vector<24x2xf32>
    %c0_13 = arith.constant 0 : index
    %c0_14 = arith.constant 0 : index
    %c0_15 = arith.constant 0 : index
    %19 = vector.load %arg6[%c0_13, %c0_14, %c0_15] : memref<9x24x24xf32, #tpu.memory_space<vmem>>, vector<1x24x24xf32>
    %20 = vector.shape_cast %19 : vector<1x24x24xf32> to vector<24x24xf32>
    %21 = vector.extract_strided_slice %17 {offsets = [0, 0], sizes = [24, 2], strides = [1, 1]} : vector<24x18xf32> to vector<24x2xf32>
    %cst_16 = arith.constant dense<0.000000e+00> : vector<24x2xf32>
    %22 = tpu.matmul %20, %21, %cst_16 {dimension_numbers = #tpu.dot_dimension_numbers<[1], [0], [0], [1], [0, 0, 1, 1], [], []>} : vector<24x24xf32>, vector<24x2xf32>, vector<24x2xf32> -> vector<24x2xf32>
    %23 = arith.addf %18, %22 : vector<24x2xf32>
    %c1 = arith.constant 1 : index
    %c0_17 = arith.constant 0 : index
    %c0_18 = arith.constant 0 : index
    %24 = vector.load %arg6[%c1, %c0_17, %c0_18] : memref<9x24x24xf32, #tpu.memory_space<vmem>>, vector<1x24x24xf32>
    %25 = vector.shape_cast %24 : vector<1x24x24xf32> to vector<24x24xf32>
    %26 = vector.extract_strided_slice %17 {offsets = [0, 2], sizes = [24, 2], strides = [1, 1]} : vector<24x18xf32> to vector<24x2xf32>
    %cst_19 = arith.constant dense<0.000000e+00> : vector<24x2xf32>
    %27 = tpu.matmul %25, %26, %cst_19 {dimension_numbers = #tpu.dot_dimension_numbers<[1], [0], [0], [1], [0, 0, 1, 1], [], []>} : vector<24x24xf32>, vector<24x2xf32>, vector<24x2xf32> -> vector<24x2xf32>
    %28 = arith.addf %23, %27 : vector<24x2xf32>
    %c2 = arith.constant 2 : index
    %c0_20 = arith.constant 0 : index
    %c0_21 = arith.constant 0 : index
    %29 = vector.load %arg6[%c2, %c0_20, %c0_21] : memref<9x24x24xf32, #tpu.memory_space<vmem>>, vector<1x24x24xf32>
    %30 = vector.shape_cast %29 : vector<1x24x24xf32> to vector<24x24xf32>
    %31 = vector.extract_strided_slice %17 {offsets = [0, 4], sizes = [24, 2], strides = [1, 1]} : vector<24x18xf32> to vector<24x2xf32>
    %cst_22 = arith.constant dense<0.000000e+00> : vector<24x2xf32>
    %32 = tpu.matmul %30, %31, %cst_22 {dimension_numbers = #tpu.dot_dimension_numbers<[1], [0], [0], [1], [0, 0, 1, 1], [], []>} : vector<24x24xf32>, vector<24x2xf32>, vector<24x2xf32> -> vector<24x2xf32>
    %33 = arith.addf %28, %32 : vector<24x2xf32>
    %c3 = arith.constant 3 : index
    %c0_23 = arith.constant 0 : index
    %c0_24 = arith.constant 0 : index
    %34 = vector.load %arg6[%c3, %c0_23, %c0_24] : memref<9x24x24xf32, #tpu.memory_space<vmem>>, vector<1x24x24xf32>
    %35 = vector.shape_cast %34 : vector<1x24x24xf32> to vector<24x24xf32>
    %36 = vector.extract_strided_slice %17 {offsets = [0, 6], sizes = [24, 2], strides = [1, 1]} : vector<24x18xf32> to vector<24x2xf32>
    %cst_25 = arith.constant dense<0.000000e+00> : vector<24x2xf32>
    %37 = tpu.matmul %35, %36, %cst_25 {dimension_numbers = #tpu.dot_dimension_numbers<[1], [0], [0], [1], [0, 0, 1, 1], [], []>} : vector<24x24xf32>, vector<24x2xf32>, vector<24x2xf32> -> vector<24x2xf32>
    %38 = arith.addf %33, %37 : vector<24x2xf32>
    %c4 = arith.constant 4 : index
    %c0_26 = arith.constant 0 : index
    %c0_27 = arith.constant 0 : index
    %39 = vector.load %arg6[%c4, %c0_26, %c0_27] : memref<9x24x24xf32, #tpu.memory_space<vmem>>, vector<1x24x24xf32>
    %40 = vector.shape_cast %39 : vector<1x24x24xf32> to vector<24x24xf32>
    %41 = vector.extract_strided_slice %17 {offsets = [0, 8], sizes = [24, 2], strides = [1, 1]} : vector<24x18xf32> to vector<24x2xf32>
    %cst_28 = arith.constant dense<0.000000e+00> : vector<24x2xf32>
    %42 = tpu.matmul %40, %41, %cst_28 {dimension_numbers = #tpu.dot_dimension_numbers<[1], [0], [0], [1], [0, 0, 1, 1], [], []>} : vector<24x24xf32>, vector<24x2xf32>, vector<24x2xf32> -> vector<24x2xf32>
    %43 = arith.addf %38, %42 : vector<24x2xf32>
    %c5 = arith.constant 5 : index
    %c0_29 = arith.constant 0 : index
    %c0_30 = arith.constant 0 : index
    %44 = vector.load %arg6[%c5, %c0_29, %c0_30] : memref<9x24x24xf32, #tpu.memory_space<vmem>>, vector<1x24x24xf32>
    %45 = vector.shape_cast %44 : vector<1x24x24xf32> to vector<24x24xf32>
    %46 = vector.extract_strided_slice %17 {offsets = [0, 10], sizes = [24, 2], strides = [1, 1]} : vector<24x18xf32> to vector<24x2xf32>
    %cst_31 = arith.constant dense<0.000000e+00> : vector<24x2xf32>
    %47 = tpu.matmul %45, %46, %cst_31 {dimension_numbers = #tpu.dot_dimension_numbers<[1], [0], [0], [1], [0, 0, 1, 1], [], []>} : vector<24x24xf32>, vector<24x2xf32>, vector<24x2xf32> -> vector<24x2xf32>
    %48 = arith.addf %43, %47 : vector<24x2xf32>
    %c6 = arith.constant 6 : index
    %c0_32 = arith.constant 0 : index
    %c0_33 = arith.constant 0 : index
    %49 = vector.load %arg6[%c6, %c0_32, %c0_33] : memref<9x24x24xf32, #tpu.memory_space<vmem>>, vector<1x24x24xf32>
    %50 = vector.shape_cast %49 : vector<1x24x24xf32> to vector<24x24xf32>
    %51 = vector.extract_strided_slice %17 {offsets = [0, 12], sizes = [24, 2], strides = [1, 1]} : vector<24x18xf32> to vector<24x2xf32>
    %cst_34 = arith.constant dense<0.000000e+00> : vector<24x2xf32>
    %52 = tpu.matmul %50, %51, %cst_34 {dimension_numbers = #tpu.dot_dimension_numbers<[1], [0], [0], [1], [0, 0, 1, 1], [], []>} : vector<24x24xf32>, vector<24x2xf32>, vector<24x2xf32> -> vector<24x2xf32>
    %53 = arith.addf %48, %52 : vector<24x2xf32>
    %c7 = arith.constant 7 : index
    %c0_35 = arith.constant 0 : index
    %c0_36 = arith.constant 0 : index
    %54 = vector.load %arg6[%c7, %c0_35, %c0_36] : memref<9x24x24xf32, #tpu.memory_space<vmem>>, vector<1x24x24xf32>
    %55 = vector.shape_cast %54 : vector<1x24x24xf32> to vector<24x24xf32>
    %56 = vector.extract_strided_slice %17 {offsets = [0, 14], sizes = [24, 2], strides = [1, 1]} : vector<24x18xf32> to vector<24x2xf32>
    %cst_37 = arith.constant dense<0.000000e+00> : vector<24x2xf32>
    %57 = tpu.matmul %55, %56, %cst_37 {dimension_numbers = #tpu.dot_dimension_numbers<[1], [0], [0], [1], [0, 0, 1, 1], [], []>} : vector<24x24xf32>, vector<24x2xf32>, vector<24x2xf32> -> vector<24x2xf32>
    %58 = arith.addf %53, %57 : vector<24x2xf32>
    %c8 = arith.constant 8 : index
    %c0_38 = arith.constant 0 : index
    %c0_39 = arith.constant 0 : index
    %59 = vector.load %arg6[%c8, %c0_38, %c0_39] : memref<9x24x24xf32, #tpu.memory_space<vmem>>, vector<1x24x24xf32>
    %60 = vector.shape_cast %59 : vector<1x24x24xf32> to vector<24x24xf32>
    %61 = vector.extract_strided_slice %17 {offsets = [0, 16], sizes = [24, 2], strides = [1, 1]} : vector<24x18xf32> to vector<24x2xf32>
    %cst_40 = arith.constant dense<0.000000e+00> : vector<24x2xf32>
    %62 = tpu.matmul %60, %61, %cst_40 {dimension_numbers = #tpu.dot_dimension_numbers<[1], [0], [0], [1], [0, 0, 1, 1], [], []>} : vector<24x24xf32>, vector<24x2xf32>, vector<24x2xf32> -> vector<24x2xf32>
    %63 = arith.addf %58, %62 : vector<24x2xf32>
    %c0_41 = arith.constant 0 : index
    %c0_42 = arith.constant 0 : index
    %64 = vector.load %arg7[%c0_41, %c0_42] : memref<24x1xf32, #tpu.memory_space<vmem>>, vector<24x1xf32>
    %65 = vector.broadcast %64 : vector<24x1xf32> to vector<24x2xf32>
    %66 = arith.mulf %63, %65 : vector<24x2xf32>
    %c0_43 = arith.constant 0 : index
    %c0_44 = arith.constant 0 : index
    %67 = vector.load %arg8[%c0_43, %c0_44] : memref<24x1xf32, #tpu.memory_space<vmem>>, vector<24x1xf32>
    %68 = vector.broadcast %67 : vector<24x1xf32> to vector<24x2xf32>
    %69 = arith.addf %66, %68 : vector<24x2xf32>
    %c0_45 = arith.constant 0 : index
    %c0_46 = arith.constant 0 : index
    %70 = vector.load %arg9[%c0_45, %c0_46] : memref<24x2xf32, #tpu.memory_space<vmem>>, vector<24x2xf32>
    tpu.vector_store %arg9[%c0_45, %c0_46], %69 {strides = array<i32>} : memref<24x2xf32, #tpu.memory_space<vmem>>, vector<24x2xf32>,
    return
  }
  func.func @transform_0(%arg0: i32) -> (i32, i32) {
    %c0_i32 = arith.constant 0 : i32
    %c0_i32_0 = arith.constant 0 : i32
    %c0_i32_1 = arith.constant 0 : i32
    return %c0_i32, %c0_i32_0 : i32, i32
  }
  func.func @transform_1(%arg0: i32) -> (i32, i32) {
    %c0_i32 = arith.constant 0 : i32
    %c0_i32_0 = arith.constant 0 : i32
    %c0_i32_1 = arith.constant 0 : i32
    return %c0_i32, %c0_i32_0 : i32, i32
  }
  func.func @transform_2(%arg0: i32) -> (i32, i32) {
    %c0_i32 = arith.constant 0 : i32
    %c0_i32_0 = arith.constant 0 : i32
    %c0_i32_1 = arith.constant 0 : i32
    return %c0_i32, %c0_i32_0 : i32, i32
  }
  func.func @transform_3(%arg0: i32) -> (i32, i32) {
    %c0_i32 = arith.constant 0 : i32
    %c0_i32_0 = arith.constant 0 : i32
    %c0_i32_1 = arith.constant 0 : i32
    return %c0_i32, %c0_i32_0 : i32, i32
  }
  func.func @transform_4(%arg0: i32) -> (i32, i32) {
    %c0_i32 = arith.constant 0 : i32
    %c0_i32_0 = arith.constant 0 : i32
    %c0_i32_1 = arith.constant 0 : i32
    return %c0_i32, %c0_i32_0 : i32, i32
  }
  func.func @transform_5(%arg0: i32) -> (i32, i32, i32) {
    %c0_i32 = arith.constant 0 : i32
    %c0_i32_0 = arith.constant 0 : i32
    %c0_i32_1 = arith.constant 0 : i32
    %c0_i32_2 = arith.constant 0 : i32
    return %c0_i32, %c0_i32_0, %c0_i32_1 : i32, i32, i32
  }
  func.func @transform_6(%arg0: i32) -> (i32, i32) {
    %c0_i32 = arith.constant 0 : i32
    %c0_i32_0 = arith.constant 0 : i32
    %c0_i32_1 = arith.constant 0 : i32
    return %c0_i32, %c0_i32_0 : i32, i32
  }
  func.func @transform_7(%arg0: i32) -> (i32, i32) {
    %c0_i32 = arith.constant 0 : i32
    %c0_i32_0 = arith.constant 0 : i32
    %c0_i32_1 = arith.constant 0 : i32
    return %c0_i32, %c0_i32_0 : i32, i32
  }
  func.func @transform_8(%arg0: i32) -> (i32, i32) {
    %c0_i32 = arith.constant 0 : i32
    %c0_i32_0 = arith.constant 0 : i32
    %c0_i32_1 = arith.constant 0 : i32
    return %c0_i32, %c0_i32_0 : i32, i32
  }
}

</mosaic_0001>

<bundles_post_ra>
// kernel: pool_agg.1
= control target key start
LH: loop header
LB: loop body
LE: loop exit
PB: predicated region body
PF: predicated region fallthrough
CT: control target
= control target key end

     0   :  { %v2166_v1 = vmov 0   ;;  %vm108_vm0 = vcmask 1041408   ;;  %vm101_vm1 = vcmask 293888   ;;  %vm2168_vm2 = vmmov 0   ;;  %s2171_s17 = smov 124   ;;  %s2175_s18 = smov 116   ;;  %s2783_s0 = inlined_call_operand.vmem [shape: bf16[36,512], index: 0, kind: input, shape index: {}]   ;;  %s2784_s1 = inlined_call_operand.vmem [shape: bf16[24,36], index: 1, kind: input, shape index: {}]   ;;  %s2785_s2 = inlined_call_operand.vmem [shape: f32[24,1], index: 2, kind: input, shape index: {}]   ;;  %s2786_s3 = inlined_call_operand.vmem [shape: f32[24,1], index: 3, kind: input, shape index: {}]   ;;  %s2787_s4 = inlined_call_operand.vmem [shape: f32[512,18], index: 4, kind: input, shape index: {}]   ;;  %s2788_s6 = inlined_call_operand.vmem [shape: f32[24,1], index: 6, kind: input, shape index: {}]   ;;  %s2789_s7 = inlined_call_operand.vmem [shape: f32[24,1], index: 7, kind: input, shape index: {}]   ;;  %s2790_s5 = inlined_call_operand.vmem [shape: f32[9,24,24], index: 5, kind: input, shape index: {}]   ;;  %s2791_s8 = inlined_call_operand.vmem [shape: f32[24,2], index: 8, kind: output, shape index: {}]  }
   0x1   :  { %v2100_v0 = vld [vmem:[%s2783_s0 + $0x4] ss:$16 sps:$4 sm:$0xff]   ;;  %153 = vmatprep.mubr.bf16.mxu1 %v2166_v1  ;;  %2058 = vset.pattern.permute.xlu0 %v2166_v1  ;;  %v2102_v2 = vld [vmem:[%s2783_s0] ss:$16 sps:$4 sm:$0xff]   ;;  %v2111_v10 = vld [vmem:[%s2783_s0 + $0xc] ss:$16 sps:$4 sm:$0xff]  }
   0x2   :  { %2059 = vset.pattern.permute.xlu1 %v2166_v1  ;;  %121 = vmatprep.subr.bf16.mxu1 %v2100_v0  ;;  %v2103_v3 = vld [vmem:[%s2783_s0 + $0x24] ss:$16 sps:$4 sm:$0xff]   ;;  %v2105_v5 = vld [vmem:[%s2783_s0 + $0x20] ss:$16 sps:$4 sm:$0xff]   ;;  %v224_v11 = vld [vmem:[%s2785_s2 + $0x8] sm:$0xff]  ;;  %s2177_s19 = smov 112  }
   0x3   :  { %v41_v4 = vld [vmem:[%s2783_s0 + $0x40] sm:$0x33]  ;;  %122 = vmatpush1.bf16.msra.mxu1 %v2102_v2  ;;  %233 = vperm.xlu1 %2059, %v224_v11   ;;  %v254_v14 = vld [vmem:[%s2786_s3 + $0x8] sm:$0xff]  ;;  %v225_v18 = vld [vmem:[%s2785_s2 + $0x10] sm:$0xff]  ;;  %vm598_vm3 = vcmask 195584   ;;  %vm1554_vm4 = vcmask 15360  }
   0x4   :  { %123 = vmatprep.subr.bf16.mxu1 %v2103_v3  ;;  %v1573_v6 = vcombine.high %v41_v4, %v41_v4  ;;  %v1572_v7 = vcombine.low %v41_v4, %v41_v4  ;;  %v223_v8 = vld [vmem:[%s2785_s2] sm:$0xff]  ;;  %v2109_v15 = vld [vmem:[%s2783_s0 + $0x8] ss:$16 sps:$4 sm:$0xff]   ;;  %v2115_v16 = vld [vmem:[%s2783_s0 + $0x2c] ss:$16 sps:$4 sm:$0xff]   ;;  %s2172_s2 = smov 122  }
   0x5   :  { %228 = vperm.xlu0 %2058, %v223_v8   ;;  %v253_v12 = vld [vmem:[%s2786_s3] sm:$0xff]  ;;  %v42_v17 = vld [vmem:[%s2783_s0 + $0x48] sm:$0x33]  ;;  %v255_v19 = vld [vmem:[%s2786_s3 + $0x10] sm:$0xff]  ;;  %s2174_s3 = smov 118  }
   0x6   :  { %v110_v9 = vsel %vm108_vm0, %v1572_v7, 0  ;;  %v2108_v13 = vld [vmem:[%s2784_s1] sm:$0xff]   ;;  %v2113_v20 = vld [vmem:[%s2783_s0 + $0x28] ss:$16 sps:$4 sm:$0xff]   ;;  %v1575_v21 = vcombine.high %v42_v17, %v42_v17  ;;  %v1574_v22 = vcombine.low %v42_v17, %v42_v17  ;;  %v373_v31 = vld [vmem:[%s2787_s4 + $0x90] sm:$0xff]  ;;  %s2173_s0 = smov 120  }
   0x7   :  { %124 = vmatpush1.bf16.msra.mxu1 %v2105_v5  ;;  %263 = vperm.xlu1 %2059, %v254_v14   ;;  %v2112_v23 = vld [vmem:[%s2784_s1 + $0x8] ss:$0 sps:$4 sm:$0xff]   ;;  %v371_v25 = vld [vmem:[%s2787_s4 + $0x80] sm:$0xff]  ;;  %v374_v32 = vld [vmem:[%s2787_s4 + $0x98] sm:$0xff]  ;;  %s2176_s1 = smov 114  }
   0x8   :  { %1576 = vmatprep.subr.msk.bf16.mxu1 %vm108_vm0, %v1573_v6  ;;  %v116_v24 = vsel %vm108_vm0, %v1574_v22, 0  ;;  %v372_v26 = vld [vmem:[%s2787_s4 + $0x88] sm:$0xff]  ;;  %v355_v28 = vld [vmem:[%s2787_s4] sm:$0xff]  ;;  %v1908_v33 = vpack.c.bf16 %v374_v32, %v373_v31  ;;  %v357_v34 = vld [vmem:[%s2787_s4 + $0x10] sm:$0xff] }
   0x9   :  { %258 = vperm.xlu0 %2058, %v253_v12   ;;  %v1904_v27 = vpack.c.bf16 %v372_v26, %v371_v25  ;;  %v356_v29 = vld [vmem:[%s2787_s4 + $0x8] sm:$0xff]  ;;  %v358_v35 = vld [vmem:[%s2787_s4 + $0x18] sm:$0xff]  ;;  %v375_v37 = vld [vmem:[%s2787_s4 + $0xa0] sm:$0xff] }
   0xa   :  { %v1906_v30 = vpack.c.bf16 %v356_v29, %v355_v28  ;;  %v1910_v36 = vpack.c.bf16 %v358_v35, %v357_v34  ;;  %v376_v38 = vld [vmem:[%s2787_s4 + $0xa8] sm:$0xff]  ;;  %v359_v40 = vld [vmem:[%s2787_s4 + $0x20] sm:$0xff]  ;;  %v377_v43 = vld [vmem:[%s2787_s4 + $0xb0] sm:$0xff] }
   0xb   :  { %126 = vmatpush1.bf16.msra.mxu1 %v110_v9  ;;  %268 = vperm.xlu1 %2059, %v255_v19   ;;  %v1912_v39 = vpack.c.bf16 %v376_v38, %v375_v37  ;;  %v360_v41 = vld [vmem:[%s2787_s4 + $0x28] sm:$0xff]  ;;  %v378_v44 = vld [vmem:[%s2787_s4 + $0xb8] sm:$0xff]  ;;  %v361_v46 = vld [vmem:[%s2787_s4 + $0x30] sm:$0xff] }
   0xc   :  { %172 = vmatprep.subr.bf16.mxu1 %v2111_v10  ;;  %v1914_v42 = vpack.c.bf16 %v360_v41, %v359_v40  ;;  %v1916_v45 = vpack.c.bf16 %v378_v44, %v377_v43  ;;  %v362_v47 = vld [vmem:[%s2787_s4 + $0x38] sm:$0xff]  ;;  %v379_v49 = vld [vmem:[%s2787_s4 + $0xc0] sm:$0xff]  ;;  %v380_v50 = vld [vmem:[%s2787_s4 + $0xc8] sm:$0xff] }
   0xd   :  { %238 = vperm.xlu0 %2058, %v225_v18   ;;  %v1918_v48 = vpack.c.bf16 %v362_v47, %v361_v46  ;;  %v1920_v51 = vpack.c.bf16 %v380_v50, %v379_v49  ;;  %v363_v52 = vld [vmem:[%s2787_s4 + $0x40] sm:$0xff]  ;;  %v364_v53 = vld [vmem:[%s2787_s4 + $0x48] sm:$0xff]  ;;  %v381_v55 = vld [vmem:[%s2787_s4 + $0xd0] sm:$0xff] }
   0xe   :  { %1577 = vmatmul.mubr.msk.bf16.vlgmr.msra.gmra.mrb[0].mxu1 %vm101_vm1, %v2108_v13  ;;  %v1922_v54 = vpack.c.bf16 %v364_v53, %v363_v52  ;;  %v382_v56 = vld [vmem:[%s2787_s4 + $0xd8] sm:$0xff]  ;;  %v365_v58 = vld [vmem:[%s2787_s4 + $0x50] sm:$0xff]  ;;  %v383_v61 = vld [vmem:[%s2787_s4 + $0xe0] sm:$0xff] }
   0xf   :  { %173 = vmatpush1.bf16.msra.mxu1 %v2109_v15  ;;  %163 = vmatprep.mubr.bf16.mxu1 %v2166_v1  ;;  %v1924_v57 = vpack.c.bf16 %v382_v56, %v381_v55  ;;  %v366_v59 = vld [vmem:[%s2787_s4 + $0x58] sm:$0xff]  ;;  %v384_v62 = vld [vmem:[%s2787_s4 + $0xe8] sm:$0xff]  ;;  %v367_v0 = vld [vmem:[%s2787_s4 + $0x60] sm:$0xff] }
  0x10   :  { %174 = vmatprep.subr.bf16.mxu1 %v2115_v16  ;;  %v1926_v60 = vpack.c.bf16 %v366_v59, %v365_v58  ;;  %v1928_v63 = vpack.c.bf16 %v384_v62, %v383_v61  ;;  %v385_v3 = vld [vmem:[%s2787_s4 + $0xf0] sm:$0xff]  ;;  %v386_v4 = vld [vmem:[%s2787_s4 + $0xf8] sm:$0xff]  ;;  %v403_v9 = vld [vmem:[%s2787_s4 + $0x180] sm:$0xff] }
  0x11   :  { %v1932_v5 = vpack.c.bf16 %v386_v4, %v385_v3  ;;  %v369_v6 = vld [vmem:[%s2787_s4 + $0x70] sm:$0xff]  ;;  %v370_v7 = vld [vmem:[%s2787_s4 + $0x78] sm:$0xff]  ;;  %v404_v10 = vld [vmem:[%s2787_s4 + $0x188] sm:$0xff] }
  0x12   :  { %v1934_v8 = vpack.c.bf16 %v370_v7, %v369_v6  ;;  %v1936_v11 = vpack.c.bf16 %v404_v10, %v403_v9 }
  0x13   :  { %175 = vmatpush1.bf16.msra.mxu1 %v2113_v20 }
  0x14   :  { %1579 = vmatprep.subr.msk.bf16.mxu1 %vm108_vm0, %v1575_v21 }
  0x16   :  { %1578 = vmatmul.mubr.msk.bf16.gmra.mrb[4].mxu1 %vm101_vm1, %v2112_v23 }
  0x17   :  { %177 = vmatpush1.bf16.msra.mxu1 %v116_v24  ;;  %204 = vmatprep.mubr.bf16.mxu1 %v2166_v1 }
  0x18   :  { %1905 = vmatprep.subr.bf16.mxu1 %v1904_v27 }
  0x1e   :  { %1580 = vmatmul.mubr.msk.bf16.vlgmr.msra.gmra.mrb[8].mxu1 %vm101_vm1, %v2108_v13 }
  0x1f   :  { %214 = vmatprep.mubr.bf16.mxu1 %v2166_v1  ;;  %1907 = vmatpush3.bf16.msra.mxu1 %v1906_v30  ;;  %v368_v1 = vld [vmem:[%s2787_s4 + $0x68] sm:$0xff] }
  0x20   :  { %1909 = vmatprep.subr.bf16.mxu1 %v1908_v33  ;;  %v1930_v2 = vpack.c.bf16 %v368_v1, %v367_v0 }
  0x23   :  { %1911 = vmatpush3.bf16.msra.mxu1 %v1910_v36 }
  0x24   :  { %1913 = vmatprep.subr.bf16.mxu1 %v1912_v39 }
  0x26   :  { %1581 = vmatmul.mubr.msk.bf16.gmra.mrb[12].mxu1 %vm101_vm1, %v2112_v23 }
  0x27   :  { %1915 = vmatpush3.bf16.msra.mxu1 %v1914_v42 }
  0x28   :  { %1917 = vmatprep.subr.bf16.mxu1 %v1916_v45 }
  0x2b   :  { %1919 = vmatpush3.bf16.msra.mxu1 %v1918_v48 }
  0x2c   :  { %1921 = vmatprep.subr.bf16.mxu1 %v1920_v51 }
  0x2f   :  { %1923 = vmatpush3.bf16.msra.mxu1 %v1922_v54 }
  0x30   :  { %1925 = vmatprep.subr.bf16.mxu1 %v1924_v57 }
  0x33   :  { %1927 = vmatpush3.bf16.msra.mxu1 %v1926_v60 }
  0x34   :  { %1929 = vmatprep.subr.bf16.mxu1 %v1928_v63 }
  0x37   :  { %1931 = vmatpush3.bf16.msra.mxu1 %v1930_v2 }
  0x38   :  { %1933 = vmatprep.subr.bf16.mxu1 %v1932_v5 }
  0x3b   :  { %1935 = vmatpush3.bf16.msra.mxu1 %v1934_v8 }
  0x3c   :  { %1937 = vmatprep.subr.bf16.mxu1 %v1936_v11 }
  0x82   :  { %v2387_v13 = vpop.permute.xlu1 %233 }
  0x84   :  { %v229_v12 = vpop.permute.xlu0 %228 }
  0x86   :  { %v2391_v20 = vpop.permute.xlu1 %263 }
  0x88   :  { %v2389_v15 = vpop.permute.xlu0 %258 }
  0x8a   :  { %v2413_v36 = vpop.permute.xlu1 %268 }
  0x8c   :  { %v2409_v30 = vpop.permute.xlu0 %238 }
  0xe1   :  { %v155_v14 = vpop.f32.mrb[0].mxu1 }
  0xe2   :  { %v241_v16 = vmul.f32 %v229_v12, %v155_v14  ;;  %v157_v17 = vpop.f32.mrb[1].mxu1 }
  0xe3   :  { %v242_v18 = vmul.f32 %v229_v12, %v157_v17  ;;  %v159_v19 = vpop.f32.mrb[2].mxu1 }
  0xe4   :  { %v2394_v21 = vadd.f32 %v2389_v15, %v241_v16  ;;  %v245_v22 = vmul.f32 %v2387_v13, %v159_v19  ;;  %v161_v23 = vpop.f32.mrb[3].mxu1 }
  0xe5   :  { %v2398_v24 = vadd.f32 %v2389_v15, %v242_v18  ;;  %v246_v25 = vmul.f32 %v2387_v13, %v161_v23  ;;  %v387_v23 = vld [vmem:[%s2787_s4 + $0x100] sm:$0xff] }
  0xe6   :  { %v283_v26 = vsub.f32 0.0, %v2394_v21  ;;  %v2403_v27 = vadd.f32 %v2391_v20, %v245_v22 }
  0xe7   :  { %v284_v28 = vsub.f32 0.0, %v2398_v24  ;;  %v2407_v29 = vadd.f32 %v2391_v20, %v246_v25  ;;  %v388_v25 = vld [vmem:[%s2787_s4 + $0x108] sm:$0xff] }
  0xe8   :  { %v295_v31 = vmul.f32 1.442695, %v283_v26  ;;  %v287_v32 = vsub.f32 0.0, %v2403_v27 }
  0xe9   :  { %v297_v33 = vmul.f32 1.442695, %v284_v28  ;;  %v288_v34 = vsub.f32 0.0, %v2407_v29  ;;  %v165_v35 = vpop.f32.mrb[4].mxu1  ;;  %v406_v28 = vld [vmem:[%s2787_s4 + $0x198] sm:$0xff] }
  0xea   :  { %2118 = vpow2.f32 %v295_v31  ;;  %v303_v37 = vmul.f32 1.442695, %v287_v32  ;;  %v249_v38 = vmul.f32 %v2409_v30, %v165_v35  ;;  %v167_v39 = vpop.f32.mrb[5].mxu1 }
  0xeb   :  { %2120 = vpow2.f32 %v297_v33  ;;  %v305_v40 = vmul.f32 1.442695, %v288_v34  ;;  %v250_v41 = vmul.f32 %v2409_v30, %v167_v39  ;;  %v169_v42 = vpop.f32.mrb[6].mxu1 }
  0xec   :  { %2122 = vpow2.f32 %v303_v37  ;;  %v2418_v43 = vadd.f32 %v2413_v36, %v249_v38  ;;  %v170_v44 = vpop.f32.mrb[7].mxu1  ;;  %v1938_v38 = vpack.c.bf16 %v388_v25, %v387_v23  ;;  %v389_v42 = vld [vmem:[%s2787_s4 + $0x110] sm:$0xff] }
  0xed   :  { %2124 = vpow2.f32 %v305_v40  ;;  %v2421_v45 = vadd.f32 %v2413_v36, %v250_v41  ;;  %v390_v44 = vld [vmem:[%s2787_s4 + $0x118] sm:$0xff]  ;;  %v397_v25 = vld [vmem:[%s2787_s4 + $0x150] sm:$0xff] }
  0xee   :  { %v291_v46 = vsub.f32 0.0, %v2418_v43 }
  0xef   :  { %v292_v47 = vsub.f32 0.0, %v2421_v45 }
  0xf0   :  { %v311_v48 = vmul.f32 1.442695, %v291_v46 }
  0xf1   :  { %v313_v49 = vmul.f32 1.442695, %v292_v47  ;;  %v206_v50 = vpop.f32.mrb[8].mxu1 }
  0xf2   :  { %2126 = vpow2.f32 %v311_v48  ;;  %v208_v51 = vpop.f32.mrb[9].mxu1  ;;  %v243_v61 = vmul.f32 %v229_v12, %v206_v50 }
  0xf3   :  { %2128 = vpow2.f32 %v313_v49  ;;  %v244_v52 = vmul.f32 %v229_v12, %v208_v51  ;;  %v210_v53 = vpop.f32.mrb[10].mxu1 }
  0xf4   :  { %v2119_v54 = vpop.eup %2118  ;;  %v212_v55 = vpop.f32.mrb[11].mxu1  ;;  %v2431_v5 = vadd.f32 %v2389_v15, %v243_v61  ;;  %v247_v6 = vmul.f32 %v2387_v13, %v210_v53 }
  0xf5   :  { %v2121_v56 = vpop.eup %2120  ;;  %v319_v57 = vadd.f32 1.0, %v2119_v54  ;;  %v2426_v58 = vadd.f32 %v2389_v15, %v244_v52  ;;  %v248_v1 = vmul.f32 %v2387_v13, %v212_v55  ;;  %v391_v54 = vld [vmem:[%s2787_s4 + $0x120] sm:$0xff]  ;;  %v392_v55 = vld [vmem:[%s2787_s4 + $0x128] sm:$0xff] }
  0xf6   :  { %v2123_v59 = vpop.eup %2122  ;;  %v320_v60 = vadd.f32 1.0, %v2121_v56  ;;  %v285_v18 = vsub.f32 0.0, %v2431_v5  ;;  %v2440_v15 = vadd.f32 %v2391_v20, %v247_v6 }
  0xf7   :  { %v2125_v62 = vpop.eup %2124  ;;  %2130 = vrcp.f32 %v319_v57  ;;  %v323_v63 = vadd.f32 1.0, %v2123_v59  ;;  %v286_v0 = vsub.f32 0.0, %v2426_v58  ;;  %v2435_v8 = vadd.f32 %v2391_v20, %v248_v1  ;;  %v405_v20 = vld [vmem:[%s2787_s4 + $0x190] sm:$0xff]  ;;  %v410_v59 = vld [vmem:[%s2787_s4 + $0x1b8] sm:$0xff] }
  0xf8   :  { %2132 = vrcp.f32 %v320_v60  ;;  %v324_v2 = vadd.f32 1.0, %v2125_v62  ;;  %v299_v31 = vmul.f32 1.442695, %v285_v18  ;;  %v289_v32 = vsub.f32 0.0, %v2440_v15  ;;  %v409_v57 = vld [vmem:[%s2787_s4 + $0x1b0] sm:$0xff] }
  0xf9   :  { %v301_v3 = vmul.f32 1.442695, %v286_v0  ;;  %v216_v4 = vpop.f32.mrb[12].mxu1  ;;  %v290_v19 = vsub.f32 0.0, %v2435_v8  ;;  %v1940_v41 = vpack.c.bf16 %v406_v28, %v405_v20  ;;  %v1946_v62 = vpack.c.bf16 %v392_v55, %v391_v54  ;;  %v393_v1 = vld [vmem:[%s2787_s4 + $0x130] sm:$0xff]  ;;  %v415_v28 = vld [vmem:[%s2787_s4 + $0x1e0] sm:$0xff] }
  0xfa   :  { %2134 = vrcp.f32 %v324_v2  ;;  %v218_v7 = vpop.f32.mrb[13].mxu1  ;;  %v251_v13 = vmul.f32 %v2409_v30, %v216_v4  ;;  %v307_v48 = vmul.f32 1.442695, %v289_v32  ;;  %v1948_v0 = vpack.c.bf16 %v410_v59, %v409_v57  ;;  %v394_v2 = vld [vmem:[%s2787_s4 + $0x138] sm:$0xff] }
  0xfb   :  { %2136 = vrcp.f32 %v323_v63  ;;  %v252_v9 = vmul.f32 %v2409_v30, %v218_v7  ;;  %v220_v10 = vpop.f32.mrb[14].mxu1  ;;  %v309_v34 = vmul.f32 1.442695, %v290_v19  ;;  %v395_v7 = vld [vmem:[%s2787_s4 + $0x140] sm:$0xff] }
  0xfc   :  { %v2127_v11 = vpop.eup %2126  ;;  %2138 = vpow2.f32 %v301_v3  ;;  %v221_v12 = vpop.f32.mrb[15].mxu1  ;;  %v2461_v33 = vadd.f32 %v2413_v36, %v251_v13  ;;  %v411_v3 = vld [vmem:[%s2787_s4 + $0x1c0] sm:$0xff] }
  0xfd   :  { %v2129_v14 = vpop.eup %2128  ;;  %v327_v16 = vadd.f32 1.0, %v2127_v11  ;;  %v2445_v22 = vadd.f32 %v2413_v36, %v252_v9  ;;  %v396_v9 = vld [vmem:[%s2787_s4 + $0x148] sm:$0xff]  ;;  %v413_v11 = vld [vmem:[%s2787_s4 + $0x1d0] sm:$0xff]  ;;  %v414_v12 = vld [vmem:[%s2787_s4 + $0x1d8] sm:$0xff] }
  0xfe   :  { %v328_v17 = vadd.f32 1.0, %v2129_v14  ;;  %v293_v49 = vsub.f32 0.0, %v2461_v33  ;;  %v1956_v23 = vpack.c.bf16 %v414_v12, %v413_v11  ;;  %v1512_v11 = vld [vmem:[%s2788_s6] sm:$0xff]  ;;  %v1513_v12 = vld [vmem:[%s2788_s6 + $0x8] sm:$0xff] }
  0xff   :  { %2140 = vrcp.f32 %v327_v16  ;;  %v294_v35 = vsub.f32 0.0, %v2445_v22 }
 0x100   :  { %2142 = vrcp.f32 %v328_v17  ;;  %v315_v60 = vmul.f32 1.442695, %v293_v49  ;;  %v1954_v17 = vpack.c.bf16 %v396_v9, %v395_v7 }
 0x101   :  { %v2131_v26 = vpop.eup %2130  ;;  %2144 = vpow2.f32 %v299_v31  ;;  %v317_v51 = vmul.f32 1.442695, %v294_v35 }
 0x102   :  { %v2133_v30 = vpop.eup %2132  ;;  %v343_v40 = vmul.f32 %v2131_v26, %v2394_v21  ;;  %v408_v21 = vld [vmem:[%s2787_s4 + $0x1a8] sm:$0xff]  ;;  %2146 = vpow2.f32 %v309_v34  ;;  %v398_v26 = vld [vmem:[%s2787_s4 + $0x158] sm:$0xff] }
 0x103   :  { %v344_v37 = vmul.f32 %v2133_v30, %v2398_v24  ;;  %v407_v24 = vld [vmem:[%s2787_s4 + $0x1a0] sm:$0xff]  ;;  %v416_v30 = vld [vmem:[%s2787_s4 + $0x1e8] sm:$0xff]  ;;  %v1958_v31 = vpack.c.bf16 %v398_v26, %v397_v25  ;;  %v1582_v26 = vld [vmem:[%s2790_s5 + $0x18] sm:$0xff] }
 0x104   :  { %v2135_v39 = vpop.eup %2134  ;;  %v1944_v53 = vpack.c.bf16 %v408_v21, %v407_v24  ;;  %v1960_v35 = vpack.c.bf16 %v416_v30, %v415_v28  ;;  %v1584_v28 = vld [vmem:[%s2790_s5 + $0x28] sm:$0xff] }
 0x105   :  { %v2137_v36 = vpop.eup %2136  ;;  %483 = vmatprep.mubr.f32.mxu1 %v344_v37  ;;  %v348_v46 = vmul.f32 %v2135_v39, %v2407_v29  ;;  %v1942_v29 = vpack.c.bf16 %v390_v44, %v389_v42  ;;  %v399_v37 = vld [vmem:[%s2787_s4 + $0x160] sm:$0xff]  ;;  %v417_v39 = vld [vmem:[%s2787_s4 + $0x1f0] sm:$0xff] }
 0x106   :  { %v2139_v47 = vpop.eup %2138  ;;  %484 = vmatmul.mubr.f32.vlgmr.msra.gmra.mrb[16].mxu1 %v343_v40  ;;  %v347_v52 = vmul.f32 %v2137_v36, %v2403_v27  ;;  %v418_v40 = vld [vmem:[%s2787_s4 + $0x1f8] sm:$0xff]  ;;  %v401_v36 = vld [vmem:[%s2787_s4 + $0x170] sm:$0xff] }
 0x107   :  { %v322_v50 = vadd.f32 1.0, %v2139_v47  ;;  %1939 = vmatpush3.bf16.msra.mxu1 %v1938_v38  ;;  %488 = vmatprep.mubr.f32.mxu1 %v348_v46  ;;  %v400_v38 = vld [vmem:[%s2787_s4 + $0x168] sm:$0xff]  ;;  %v1964_v44 = vpack.c.bf16 %v418_v40, %v417_v39  ;;  %v402_v46 = vld [vmem:[%s2787_s4 + $0x178] sm:$0xff]  ;;  %v581_v40 = vld [vmem:[%s2790_s5 + $0x10] sm:$0xff] }
 0x108   :  { %1941 = vmatprep.subr.bf16.mxu1 %v1940_v41  ;;  %v1962_v42 = vpack.c.bf16 %v400_v38, %v399_v37  ;;  %v1966_v24 = vpack.c.bf16 %v402_v46, %v401_v36  ;;  %v580_v37 = vld [vmem:[%s2790_s5 + $0x8] sm:$0xff]  ;;  %v1592_v46 = vld [vmem:[%s2790_s5 + $0x38] sm:$0xff] }
 0x109   :  { %v2141_v56 = vpop.eup %2140  ;;  %2148 = vrcp.f32 %v322_v50 }
 0x10a   :  { %v2143_v27 = vpop.eup %2142  ;;  %2150 = vpow2.f32 %v307_v48  ;;  %489 = vmatmul.mubr.f32.gmra.mrb[18].mxu1 %v347_v52  ;;  %v351_v63 = vmul.f32 %v2141_v56, %v2418_v43  ;;  %v1950_v43 = vpack.c.bf16 %v394_v2, %v393_v1 }
 0x10b   :  { %2152 = vpow2.f32 %v317_v51  ;;  %1943 = vmatpush3.bf16.msra.mxu1 %v1942_v29  ;;  %v352_v61 = vmul.f32 %v2143_v27, %v2421_v45  ;;  %v412_v45 = vld [vmem:[%s2787_s4 + $0x1c8] sm:$0xff]  ;;  %v2145_v4 = vpop.eup %2144  ;;  %s2170_s4 = smov 126  }
 0x10c   :  { %1945 = vmatprep.subr.bf16.mxu1 %v1944_v53  ;;  %2154 = vpow2.f32 %v315_v60  ;;  %v1952_v6 = vpack.c.bf16 %v412_v45, %v411_v3  ;;  %v2147_v10 = vpop.eup %2146  ;;  %v321_v16 = vadd.f32 1.0, %v2145_v4  ;;  %v2169_v4 = vmov 0.0  }
 0x10d   :  { %493 = vmatprep.mubr.f32.mxu1 %v352_v61  ;;  %v326_v13 = vadd.f32 1.0, %v2147_v10  ;;  %1775 = vmatprep.mubr.msk.f32.mxu0 %vm2168_vm2, %v2169_v4 }
 0x10e   :  { %494 = vmatmul.mubr.f32.gmra.mrb[20].mxu1 %v351_v63  ;;  %2156 = vrcp.f32 %v321_v16  ;;  %v1533_v16 = vld [vmem:[%s2789_s7] sm:$0xff] }
 0x10f   :  { %1947 = vmatpush3.bf16.msra.mxu1 %v1946_v62  ;;  %2158 = vrcp.f32 %v326_v13 }
 0x110   :  { %1949 = vmatprep.subr.bf16.mxu1 %v1948_v0 }
 0x113   :  { %v2149_v14 = vpop.eup %2148  ;;  %1951 = vmatpush3.bf16.msra.mxu1 %v1950_v43 }
 0x114   :  { %v2151_v18 = vpop.eup %2150  ;;  %1953 = vmatprep.subr.bf16.mxu1 %v1952_v6  ;;  %v346_v19 = vmul.f32 %v2149_v14, %v2426_v58  ;;  %v1514_v14 = vld [vmem:[%s2788_s6 + $0x10] sm:$0xff] }
 0x115   :  { %v2153_v20 = vpop.eup %2152  ;;  %v325_v58 = vadd.f32 1.0, %v2151_v18  ;;  %v1535_v18 = vld [vmem:[%s2789_s7 + $0x10] sm:$0xff] }
 0x116   :  { %563 = vmatprep.mubr.f32.mxu1 %v346_v19  ;;  %v2155_v32 = vpop.eup %2154  ;;  %v330_v34 = vadd.f32 1.0, %v2153_v20 }
 0x117   :  { %1955 = vmatpush3.bf16.msra.mxu1 %v1954_v17  ;;  %2160 = vrcp.f32 %v325_v58  ;;  %v329_v41 = vadd.f32 1.0, %v2155_v32  ;;  %v1534_v17 = vld [vmem:[%s2789_s7 + $0x8] sm:$0xff]  ;;  %v1583_v58 = vld [vmem:[%s2790_s5 + $0x20] sm:$0xff] }
 0x118   :  { %1957 = vmatprep.subr.bf16.mxu1 %v1956_v23  ;;  %2162 = vrcp.f32 %v330_v34  ;;  %v2157_v21 = vpop.eup %2156  ;;  %v579_v34 = vld [vmem:[%s2790_s5] sm:$0xff] }
 0x119   :  { %2164 = vrcp.f32 %v329_v41  ;;  %v2159_v47 = vpop.eup %2158  ;;  %v345_v48 = vmul.f32 %v2157_v21, %v2431_v5 }
 0x11a   :  { %v350_v50 = vmul.f32 %v2159_v47, %v2435_v8  ;;  %v1593_v47 = vld [vmem:[%s2790_s5 + $0x40] sm:$0xff] }
 0x11b   :  { %1959 = vmatpush3.bf16.msra.mxu1 %v1958_v31 }
 0x11c   :  { %1961 = vmatprep.subr.bf16.mxu1 %v1960_v35 }
 0x11f   :  { %1963 = vmatpush3.bf16.msra.mxu1 %v1962_v42 }
 0x120   :  { %1965 = vmatprep.subr.bf16.mxu1 %v1964_v44  ;;  %v1591_v44 = vld [vmem:[%s2790_s5 + $0x30] sm:$0xff] }
 0x121   :  { %v2161_v49 = vpop.eup %2160 }
 0x122   :  { %v2163_v51 = vpop.eup %2162  ;;  %v349_v29 = vmul.f32 %v2161_v49, %v2440_v15  ;;  %v2167_v15 = vmov 0.0|0.0  }
 0x123   :  { %1967 = vmatpush3.bf16.msra.mxu1 %v1966_v24  ;;  %v2165_v52 = vpop.eup %2164  ;;  %v354_v53 = vmul.f32 %v2163_v51, %v2445_v22  ;;  %1968 = vmatprep.subr.bf16.mxu0 %v2167_v15 }
 0x124   :  { %v353_v54 = vmul.f32 %v2165_v52, %v2461_v33  ;;  %1995 = vmatprep.subr.bf16.mxu1 %v2167_v15 }
 0x126   :  { %564 = vmatmul.mubr.f32.vlgmr.msra.gmra.mrb[22].mxu1 %v345_v48 }
 0x127   :  { %568 = vmatprep.mubr.f32.mxu1 %v350_v50  ;;  %v1597_v50 = vld [vmem:[%s2790_s5 + $0x48] sm:$0xff] }
 0x12a   :  { %569 = vmatmul.mubr.f32.gmra.mrb[24].mxu1 %v349_v29  ;;  %v1598_v29 = vld [vmem:[%s2790_s5 + $0x50] sm:$0xff] }
 0x12b   :  { %573 = vmatprep.mubr.f32.mxu1 %v354_v53 }
 0x12e   :  { %574 = vmatmul.mubr.f32.gmra.mrb[26].mxu1 %v353_v54  ;;  %v1599_v54 = vld [vmem:[%s2790_s5 + $0x58] sm:$0xff] }
 0x12f   :  { %1781 = vmatprep.mubr.msk.f32.mxu1 %vm2168_vm2, %v2169_v4 }
 0x1d9   :  { %v1665_v55 = vpop.f32.mrb[16].mxu1 }
 0x1da   :  { %v1666_v56 = vpop.f32.mrb[17].mxu1 }
 0x1db   :  { %v1667_v57 = vadd.f32 %v1666_v56, %v1665_v55 }
 0x1dd   :  { %v1668_v5 = vpop.f32.mrb[18].mxu1 }
 0x1de   :  { %v1669_v59 = vpop.f32.mrb[19].mxu1 }
 0x1df   :  { %v1670_v27 = vadd.f32 %v1669_v59, %v1668_v5  ;;  %v1604_v59 = vld [vmem:[%s2790_s5 + $0x68] sm:$0xff] }
 0x1e1   :  { %v1671_v8 = vpop.f32.mrb[20].mxu1 }
 0x1e2   :  { %v1672_v60 = vpop.f32.mrb[21].mxu1 }
 0x1e3   :  { %v1673_v61 = vadd.f32 %v1672_v60, %v1671_v8  ;;  %v1605_v60 = vld [vmem:[%s2790_s5 + $0x70] sm:$0xff] }
 0x1f9   :  { %v1706_v62 = vpop.f32.mrb[22].mxu1 }
 0x1fa   :  { %v1707_v63 = vpop.f32.mrb[23].mxu1 }
 0x1fb   :  { %v1708_v22 = vadd.f32 %v1707_v63, %v1706_v62  ;;  %v1609_v63 = vld [vmem:[%s2790_s5 + $0x78] sm:$0xff] }
 0x1fd   :  { %v2557_v0 = vadd.f32 %v1708_v22, %v1667_v57  ;;  %v1709_v33 = vpop.f32.mrb[24].mxu1  ;;  %v1603_v57 = vld [vmem:[%s2790_s5 + $0x60] sm:$0xff] }
 0x1fe   :  { %v1710_v1 = vpop.f32.mrb[25].mxu1 }
 0x1ff   :  { %v1711_v2 = vadd.f32 %v1710_v1, %v1709_v33 }
 0x201   :  { %v2559_v3 = vadd.f32 %v1711_v2, %v1670_v27  ;;  %v1712_v45 = vpop.f32.mrb[26].mxu1  ;;  %v1611_v2 = vld [vmem:[%s2790_s5 + $0x88] sm:$0xff] }
 0x202   :  { %v1713_v43 = vpop.f32.mrb[27].mxu1 }
 0x203   :  { %v1714_v6 = vadd.f32 %v1713_v43, %v1712_v45  ;;  %v2060_v7 = vpack.i.bf16 %v2559_v3, %v2557_v0  ;;  %v1972_v10 = vpack.c.bf16 %v2559_v3, %v2557_v0  ;;  %v1610_v0 = vld [vmem:[%s2790_s5 + $0x80] sm:$0xff]  ;;  %v1615_v43 = vld [vmem:[%s2790_s5 + $0x90] sm:$0xff] }
 0x205   :  { %v2567_v9 = vadd.f32 %v1714_v6, %v1673_v61  ;;  %2061 = vrot.lane.b32.xlu0 %v2060_v7, %s2170_s4 }
 0x207   :  { %593 = vrot.lane.b32.xlu1 %v2567_v9, %s2170_s4 }
 0x209   :  { %2066 = vrot.lane.b32.xlu0 %v2060_v7, %s2171_s17 }
 0x20b   :  { %785 = vrot.lane.b32.xlu1 %v2567_v9, %s2171_s17 }
 0x20d   :  { %2071 = vrot.lane.b32.xlu0 %v2060_v7, %s2172_s2 }
 0x20f   :  { %890 = vrot.lane.b32.xlu1 %v2567_v9, %s2172_s2 }
 0x211   :  { %2076 = vrot.lane.b32.xlu0 %v2060_v7, %s2173_s0 }
 0x213   :  { %995 = vrot.lane.b32.xlu1 %v2567_v9, %s2173_s0 }
 0x215   :  { %2081 = vrot.lane.b32.xlu0 %v2060_v7, %s2174_s3 }
 0x217   :  { %1100 = vrot.lane.b32.xlu1 %v2567_v9, %s2174_s3 }
 0x219   :  { %2086 = vrot.lane.b32.xlu0 %v2060_v7, %s2175_s18 }
 0x21b   :  { %1205 = vrot.lane.b32.xlu1 %v2567_v9, %s2175_s18 }
 0x21d   :  { %2091 = vrot.lane.b32.xlu0 %v2060_v7, %s2176_s1 }
 0x21f   :  { %1310 = vrot.lane.b32.xlu1 %v2567_v9, %s2176_s1 }
 0x221   :  { %2096 = vrot.lane.b32.xlu0 %v2060_v7, %s2177_s19  ;;  %v1616_v7 = vld [vmem:[%s2790_s5 + $0x98] sm:$0xff] }
 0x223   :  { %1415 = vrot.lane.b32.xlu1 %v2567_v9, %s2177_s19 }
 0x225   :  { %1517 = vperm.xlu0 %2058, %v1512_v11   ;;  %v1617_v11 = vld [vmem:[%s2790_s5 + $0xa0] sm:$0xff] }
 0x227   :  { %1522 = vperm.xlu1 %2059, %v1513_v12  }
 0x229   :  { %1527 = vperm.xlu0 %2058, %v1514_v14  }
 0x22b   :  { %1538 = vperm.xlu1 %2059, %v1533_v16   ;;  %v1621_v16 = vld [vmem:[%s2790_s5 + $0xa8] sm:$0xff] }
 0x22d   :  { %1543 = vperm.xlu0 %2058, %v1534_v17  }
 0x22f   :  { %1548 = vperm.xlu1 %2059, %v1535_v18  }
 0x277   :  { %v2062_v13 = vpop.permute.xlu0 %2061 }
 0x278   :  { %v2064_v19 = vunpack.i.h.bf16 %v2062_v13  ;;  %v2063_v23 = vunpack.i.l.bf16 %v2062_v13  ;;  %v1623_v13 = vld [vmem:[%s2790_s5 + $0xb8] sm:$0xff] }
 0x279   :  { %v594_v20 = vpop.permute.xlu1 %593 }
 0x27a   :  { %v1969_v25 = vpack.c.bf16 %v2064_v19, %v2063_v23  ;;  %v1627_v19 = vld [vmem:[%s2790_s5 + $0xc0] sm:$0xff]  ;;  %v1628_v23 = vld [vmem:[%s2790_s5 + $0xc8] sm:$0xff] }
 0x27b   :  { %v2067_v30 = vpop.permute.xlu0 %2066 }
 0x27c   :  { %1970 = vmatpush3.bf16.msra.mxu0 %v1969_v25  ;;  %1997 = vmatpush3.bf16.msra.mxu1 %v1969_v25  ;;  %v2069_v31 = vunpack.i.h.bf16 %v2067_v30  ;;  %v2068_v32 = vunpack.i.l.bf16 %v2067_v30  ;;  %v1629_v25 = vld [vmem:[%s2790_s5 + $0xd0] sm:$0xff] }
 0x27d   :  { %1773 = vmatprep.subr.mxu0 %v2169_v4  ;;  %1996 = vmatprep.subr.mxu1 %v2169_v4  ;;  %v786_v38 = vpop.permute.xlu1 %785 }
 0x27e   :  { %v1975_v35 = vpack.c.bf16 %v2069_v31, %v2068_v32 }
 0x27f   :  { %v2072_v39 = vpop.permute.xlu0 %2071 }
 0x280   :  { %1774 = vmatpush3.msra.mxu0 %v594_v20  ;;  %1998 = vmatpush3.msra.mxu1 %v594_v20  ;;  %v2074_v41 = vunpack.i.h.bf16 %v2072_v39  ;;  %v2073_v42 = vunpack.i.l.bf16 %v2072_v39 }
 0x281   :  { %1776 = vmatmul.mubr.msk.f32.vlgmr.msra.gmra.mrb[0].mxu0 %vm598_vm3, %v1582_v26  ;;  %1971 = vmatprep.subr.bf16.mxu0 %v2167_v15  ;;  %v891_v24 = vpop.permute.xlu1 %890 }
 0x282   :  { %1973 = vmatpush3.bf16.msra.mxu0 %v1972_v10  ;;  %1778 = vmatprep.mubr.msk.f32.mxu0 %vm2168_vm2, %v2169_v4  ;;  %v1978_v36 = vpack.c.bf16 %v2074_v41, %v2073_v42 }
 0x283   :  { %1788 = vmatprep.subr.mxu0 %v2169_v4  ;;  %1782 = vmatmul.mubr.msk.f32.vlgmr.msra.gmra.mrb[28].mxu1 %vm598_vm3, %v1584_v28  ;;  %v2077_v21 = vpop.permute.xlu0 %2076 }
 0x284   :  { %v2079_v48 = vunpack.i.h.bf16 %v2077_v21  ;;  %v2078_v49 = vunpack.i.l.bf16 %v2077_v21 }
 0x285   :  { %1779 = vmatmul.mubr.msk.f32.gmra.mrb[2].mxu0 %vm598_vm3, %v1583_v58  ;;  %v996_v52 = vpop.permute.xlu1 %995 }
 0x286   :  { %1789 = vmatpush3.msra.mxu0 %v2567_v9  ;;  %1790 = vmatprep.mubr.msk.f32.mxu0 %vm2168_vm2, %v2169_v4  ;;  %v1981_v51 = vpack.c.bf16 %v2079_v48, %v2078_v49 }
 0x287   :  { %1974 = vmatprep.subr.bf16.mxu0 %v2167_v15  ;;  %v2082_v53 = vpop.permute.xlu0 %2081 }
 0x288   :  { %v2084_v55 = vunpack.i.h.bf16 %v2082_v53  ;;  %v2083_v56 = vunpack.i.l.bf16 %v2082_v53 }
 0x289   :  { %1791 = vmatmul.mubr.msk.f32.vlgmr.msra.gmra.mrb[0].mxu0 %vm598_vm3, %v579_v34  ;;  %v1101_v27 = vpop.permute.xlu1 %1100 }
 0x28a   :  { %1976 = vmatpush3.bf16.msra.mxu0 %v1975_v35  ;;  %1793 = vmatprep.mubr.msk.f32.mxu0 %vm2168_vm2, %v2169_v4  ;;  %v1984_v5 = vpack.c.bf16 %v2084_v55, %v2083_v56 }
 0x28b   :  { %1803 = vmatprep.subr.mxu0 %v2169_v4  ;;  %v2087_v8 = vpop.permute.xlu0 %2086 }
 0x28c   :  { %v2089_v61 = vunpack.i.h.bf16 %v2087_v8  ;;  %v2088_v62 = vunpack.i.l.bf16 %v2087_v8 }
 0x28d   :  { %1794 = vmatmul.mubr.msk.f32.gmra.mrb[2].mxu0 %vm598_vm3, %v580_v37  ;;  %v1206_v33 = vpop.permute.xlu1 %1205 }
 0x28e   :  { %1804 = vmatpush3.msra.mxu0 %v786_v38  ;;  %1796 = vmatprep.mubr.msk.f32.mxu0 %vm2168_vm2, %v2169_v4  ;;  %v1987_v22 = vpack.c.bf16 %v2089_v61, %v2088_v62 }
 0x28f   :  { %1977 = vmatprep.subr.bf16.mxu0 %v2167_v15  ;;  %v2092_v1 = vpop.permute.xlu0 %2091 }
 0x290   :  { %v2094_v3 = vunpack.i.h.bf16 %v2092_v1  ;;  %v2093_v45 = vunpack.i.l.bf16 %v2092_v1 }
 0x291   :  { %1797 = vmatmul.mubr.msk.f32.gmra.mrb[4].mxu0 %vm598_vm3, %v581_v40  ;;  %v1311_v9 = vpop.permute.xlu1 %1310 }
 0x292   :  { %1805 = vmatprep.mubr.msk.f32.mxu0 %vm2168_vm2, %v2169_v4  ;;  %v1990_v6 = vpack.c.bf16 %v2094_v3, %v2093_v45 }
 0x293   :  { %v2097_v10 = vpop.permute.xlu0 %2096 }
 0x294   :  { %v2099_v12 = vunpack.i.h.bf16 %v2097_v10  ;;  %v2098_v14 = vunpack.i.l.bf16 %v2097_v10 }
 0x295   :  { %1806 = vmatmul.mubr.msk.f32.vlgmr.msra.gmra.mrb[0].mxu0 %vm598_vm3, %v1591_v44  ;;  %v1416_v18 = vpop.permute.xlu1 %1415 }
 0x296   :  { %1979 = vmatpush3.bf16.msra.mxu0 %v1978_v36  ;;  %1808 = vmatprep.mubr.msk.f32.mxu0 %vm2168_vm2, %v2169_v4  ;;  %v1993_v17 = vpack.c.bf16 %v2099_v12, %v2098_v14 }
 0x297   :  { %1818 = vmatprep.subr.mxu0 %v2169_v4 }
 0x299   :  { %1809 = vmatmul.mubr.msk.f32.gmra.mrb[2].mxu0 %vm598_vm3, %v1592_v46 }
 0x29a   :  { %1819 = vmatpush3.msra.mxu0 %v891_v24  ;;  %1811 = vmatprep.mubr.msk.f32.mxu0 %vm2168_vm2, %v2169_v4 }
 0x29b   :  { %1980 = vmatprep.subr.bf16.mxu0 %v2167_v15 }
 0x29d   :  { %1812 = vmatmul.mubr.msk.f32.gmra.mrb[4].mxu0 %vm598_vm3, %v1593_v47 }
 0x29e   :  { %1820 = vmatprep.mubr.msk.f32.mxu0 %vm2168_vm2, %v2169_v4 }
 0x2a1   :  { %1821 = vmatmul.mubr.msk.f32.vlgmr.msra.gmra.mrb[0].mxu0 %vm598_vm3, %v1597_v50 }
 0x2a2   :  { %1982 = vmatpush3.bf16.msra.mxu0 %v1981_v51  ;;  %1823 = vmatprep.mubr.msk.f32.mxu0 %vm2168_vm2, %v2169_v4 }
 0x2a3   :  { %1833 = vmatprep.subr.mxu0 %v2169_v4 }
 0x2a4   :  { %v1518_v28 = vpop.permute.xlu0 %1517 }
 0x2a5   :  { %1824 = vmatmul.mubr.msk.f32.gmra.mrb[2].mxu0 %vm598_vm3, %v1598_v29 }
 0x2a6   :  { %1834 = vmatpush3.msra.mxu0 %v996_v52  ;;  %1826 = vmatprep.mubr.msk.f32.mxu0 %vm2168_vm2, %v2169_v4  ;;  %v1523_v30 = vpop.permute.xlu1 %1522 }
 0x2a7   :  { %1983 = vmatprep.subr.bf16.mxu0 %v2167_v15 }
 0x2a8   :  { %v1528_v58 = vpop.permute.xlu0 %1527 }
 0x2a9   :  { %1827 = vmatmul.mubr.msk.f32.gmra.mrb[4].mxu0 %vm598_vm3, %v1599_v54 }
 0x2aa   :  { %1835 = vmatprep.mubr.msk.f32.mxu0 %vm2168_vm2, %v2169_v4  ;;  %v1539_v35 = vpop.permute.xlu1 %1538 }
 0x2ac   :  { %v1544_v40 = vpop.permute.xlu0 %1543 }
 0x2ad   :  { %1836 = vmatmul.mubr.msk.f32.vlgmr.msra.gmra.mrb[0].mxu0 %vm598_vm3, %v1603_v57 }
 0x2ae   :  { %1985 = vmatpush3.bf16.msra.mxu0 %v1984_v5  ;;  %1838 = vmatprep.mubr.msk.f32.mxu0 %vm2168_vm2, %v2169_v4  ;;  %v1549_v24 = vpop.permute.xlu1 %1548 }
 0x2af   :  { %1848 = vmatprep.subr.mxu0 %v2169_v4 }
 0x2b1   :  { %1839 = vmatmul.mubr.msk.f32.gmra.mrb[2].mxu0 %vm598_vm3, %v1604_v59 }
 0x2b2   :  { %1849 = vmatpush3.msra.mxu0 %v1101_v27  ;;  %1841 = vmatprep.mubr.msk.f32.mxu0 %vm2168_vm2, %v2169_v4 }
 0x2b3   :  { %1986 = vmatprep.subr.bf16.mxu0 %v2167_v15 }
 0x2b5   :  { %1842 = vmatmul.mubr.msk.f32.gmra.mrb[4].mxu0 %vm598_vm3, %v1605_v60 }
 0x2b6   :  { %1850 = vmatprep.mubr.msk.f32.mxu0 %vm2168_vm2, %v2169_v4 }
 0x2b9   :  { %1851 = vmatmul.mubr.msk.f32.vlgmr.msra.gmra.mrb[0].mxu0 %vm598_vm3, %v1609_v63 }
 0x2ba   :  { %1988 = vmatpush3.bf16.msra.mxu0 %v1987_v22  ;;  %1853 = vmatprep.mubr.msk.f32.mxu0 %vm2168_vm2, %v2169_v4 }
 0x2bb   :  { %1863 = vmatprep.subr.mxu0 %v2169_v4 }
 0x2bd   :  { %1854 = vmatmul.mubr.msk.f32.gmra.mrb[2].mxu0 %vm598_vm3, %v1610_v0 }
 0x2be   :  { %1864 = vmatpush3.msra.mxu0 %v1206_v33  ;;  %1856 = vmatprep.mubr.msk.f32.mxu0 %vm2168_vm2, %v2169_v4 }
 0x2bf   :  { %1989 = vmatprep.subr.bf16.mxu0 %v2167_v15 }
 0x2c1   :  { %1857 = vmatmul.mubr.msk.f32.gmra.mrb[4].mxu0 %vm598_vm3, %v1611_v2 }
 0x2c2   :  { %1865 = vmatprep.mubr.msk.f32.mxu0 %vm2168_vm2, %v2169_v4 }
 0x2c5   :  { %1866 = vmatmul.mubr.msk.f32.vlgmr.msra.gmra.mrb[0].mxu0 %vm598_vm3, %v1615_v43 }
 0x2c6   :  { %1991 = vmatpush3.bf16.msra.mxu0 %v1990_v6  ;;  %1868 = vmatprep.mubr.msk.f32.mxu0 %vm2168_vm2, %v2169_v4 }
 0x2c7   :  { %1878 = vmatprep.subr.mxu0 %v2169_v4 }
 0x2c9   :  { %1869 = vmatmul.mubr.msk.f32.gmra.mrb[2].mxu0 %vm598_vm3, %v1616_v7 }
 0x2ca   :  { %1879 = vmatpush3.msra.mxu0 %v1311_v9  ;;  %1871 = vmatprep.mubr.msk.f32.mxu0 %vm2168_vm2, %v2169_v4 }
 0x2cb   :  { %1992 = vmatprep.subr.bf16.mxu0 %v2167_v15  ;;  %v1622_v15 = vld [vmem:[%s2790_s5 + $0xb0] sm:$0xff] }
 0x2cd   :  { %1872 = vmatmul.mubr.msk.f32.gmra.mrb[4].mxu0 %vm598_vm3, %v1617_v11 }
 0x2ce   :  { %1880 = vmatprep.mubr.msk.f32.mxu0 %vm2168_vm2, %v2169_v4 }
 0x2d1   :  { %1881 = vmatmul.mubr.msk.f32.vlgmr.msra.gmra.mrb[0].mxu0 %vm598_vm3, %v1621_v16 }
 0x2d2   :  { %1994 = vmatpush3.bf16.msra.mxu0 %v1993_v17  ;;  %1883 = vmatprep.mubr.msk.f32.mxu0 %vm2168_vm2, %v2169_v4 }
 0x2d3   :  { %1893 = vmatprep.subr.mxu0 %v2169_v4 }
 0x2d5   :  { %1884 = vmatmul.mubr.msk.f32.gmra.mrb[2].mxu0 %vm598_vm3, %v1622_v15 }
 0x2d6   :  { %1894 = vmatpush3.msra.mxu0 %v1416_v18  ;;  %1886 = vmatprep.mubr.msk.f32.mxu0 %vm2168_vm2, %v2169_v4 }
 0x2d9   :  { %1887 = vmatmul.mubr.msk.f32.gmra.mrb[4].mxu0 %vm598_vm3, %v1623_v13 }
 0x2da   :  { %1895 = vmatprep.mubr.msk.f32.mxu0 %vm2168_vm2, %v2169_v4 }
 0x2dd   :  { %1896 = vmatmul.mubr.msk.f32.vlgmr.msra.gmra.mrb[0].mxu0 %vm598_vm3, %v1627_v19 }
 0x2de   :  { %1898 = vmatprep.mubr.msk.f32.mxu0 %vm2168_vm2, %v2169_v4 }
 0x2e1   :  { %1899 = vmatmul.mubr.msk.f32.gmra.mrb[2].mxu0 %vm598_vm3, %v1628_v23 }
 0x2e2   :  { %1901 = vmatprep.mubr.msk.f32.mxu0 %vm2168_vm2, %v2169_v4 }
 0x2e5   :  { %1902 = vmatmul.mubr.msk.f32.gmra.mrb[4].mxu0 %vm598_vm3, %v1629_v25 }
 0x356   :  { %v684_v26 = vpop.f32.mrb[28].mxu1 }
 0x357   :  { %v1783_v20 = vpop.f32.mrb[29].mxu1 }
 0x3b0   :  { %v1495_v31 = vpop.f32.mrb[0].mxu0 }
 0x3b1   :  { %v1530_v32 = vmul.f32 %v1518_v28, %v1495_v31  ;;  %v1897_v34 = vpop.f32.mrb[1].mxu0 }
 0x3b3   :  { %v1551_v37 = vadd.f32 %v1539_v35, %v1530_v32 }
 0x3b4   :  { %v1500_v38 = vpop.f32.mrb[2].mxu0 }
 0x3b5   :  { %1555 = vst.msk [vmem:[%s2791_s8] sm:$0xff] %vm1554_vm4, %v1551_v37  ;;  %v1531_v4 = vmul.f32 %v1523_v30, %v1500_v38  ;;  %v1900_v39 = vpop.f32.mrb[3].mxu0 }
 0x3b7   :  { %v1552_v41 = vadd.f32 %v1544_v40, %v1531_v4 }
 0x3b8   :  { %v1505_v42 = vpop.f32.mrb[4].mxu0 }
 0x3b9   :  { %1556 = vst.msk [vmem:[%s2791_s8 + $0x8] sm:$0xff] %vm1554_vm4, %v1552_v41  ;;  %v1999_v44 = vadd.f32 %v1505_v42, %v684_v26  ;;  %v1903_v36 = vpop.f32.mrb[5].mxu0 }
 0x3bb   :  { %v1532_v46 = vmul.f32 %v1999_v44, %v1528_v58 }
 0x3bd   :  { %v1553_v21 = vadd.f32 %v1549_v24, %v1532_v46 }
 0x3bf   :  { %1557 = vst.msk [vmem:[%s2791_s8 + $0x10] sm:$0xff] %vm1554_vm4, %v1553_v21 }

</bundles_post_ra>
